<compile_context>
chip_gen: v7x
topology: tpu7x:2x2x1
jax: 0.10.0
libtpu: 0.0.40
codegen_flags: <defaults>
</compile_context>

<pallas_src>
import jax
import jax.numpy as jnp
from jax.experimental import pallas as pl
from jax.experimental.pallas import tpu as pltpu


def _predicate_filter_kernel(idx_ref, feat_ref, emb_ref, out_ref):
    # idx_ref : SMEM (1,) int32   -- target concept row (scalar prefetch)
    # feat_ref: VMEM (TM, D)      -- tile of object features
    # emb_ref : VMEM (C, D)       -- all candidate concept embeddings (resident)
    # out_ref : VMEM (1, TM)      -- lane-dense filter logits for this tile
    feats = feat_ref[...]                                   # (TM, D)
    embs = emb_ref[...]                                     # (C, D)

    # Entailment logits for every (candidate, object) pair on the MXU.
    # Contract the feature dim of both operands directly (no transpose);
    # objects end up on the lane axis, candidates on the sublane axis.
    logits = jax.lax.dot_general(
        embs, feats,
        dimension_numbers=(((1,), (1,)), ((), ())),
        preferred_element_type=jnp.float32)                 # (C, TM) f32
    probs = jax.nn.sigmoid(logits)                          # (C, TM)  EUP

    # Masked sublane reduces: target row and the sum of all other candidates.
    k = idx_ref[0]
    sel = jax.lax.broadcasted_iota(jnp.int32, (probs.shape[0], 1), 0) == k
    num = jnp.sum(jnp.where(sel, probs, 0.0), axis=0, keepdims=True)   # (1, TM)
    rest = jnp.sum(jnp.where(sel, 0.0, probs), axis=0, keepdims=True)  # (1, TM)

    # logit(num / (num + rest)) == log(num) - log(rest): no reciprocal, no
    # (denom - num) cancellation when the target concept dominates.
    out_ref[...] = jnp.log(num) - jnp.log(rest)


def _pick_tile_m(n, *, max_tile=2048, min_tiles=4):
    """Largest lane-aligned tile that still leaves >= min_tiles grid steps."""
    t = -(-n // min_tiles)              # cdiv(n, min_tiles)
    t = ((t + 127) // 128) * 128        # round up to lane width
    return max(128, min(t, max_tile))


def predicate_filter(features, concept_embeddings, concept_index,
                     *, tile_m=None, use_bf16_matmul=True, feature_buffers=2):
    """Pallas wrapper.

    features:            (N, D) float    -- object features
    concept_embeddings:  (C, D) float    -- all candidates of the parent type
    concept_index:       (1,)   int32    -- which row is the target concept
    returns:             (N, 1) float32  -- 'end' filter logits
    """
    n, d = features.shape
    c, d2 = concept_embeddings.shape
    assert d == d2

    if use_bf16_matmul:
        # bf16 MXU operands (default on all gens), f32 accumulation + epilogue.
        features = features.astype(jnp.bfloat16)
        concept_embeddings = concept_embeddings.astype(jnp.bfloat16)

    if tile_m is None:
        tile_m = _pick_tile_m(n)

    # No host-side jnp.pad of features: the last block may be ragged; garbage
    # columns only appear in output lanes that are sliced off below.
    num_tiles = pl.cdiv(n, tile_m)
    n_out = num_tiles * tile_m

    # Explicit scoped-VMEM budget (matters on v5e's 16 MiB default once tiles
    # grow; stays far under v7x's 64 MiB physical VMEM at these shapes).
    feat_bytes = tile_m * d * features.dtype.itemsize
    emb_bytes = c * d * concept_embeddings.dtype.itemsize
    needed = (max(feature_buffers, 2) * feat_bytes + 2 * emb_bytes
              + 2 * tile_m * 4 + (2 << 20))
    vmem_limit = int(min(64 << 20, max(16 << 20, 2 * needed)))

    feat_spec_kwargs = {}
    if feature_buffers != 2:
        # Deeper pipelining only if profiling shows exposed DMA per step.
        feat_spec_kwargs["pipeline_mode"] = pl.Buffered(feature_buffers)

    out = pl.pallas_call(
        _predicate_filter_kernel,
        out_shape=jax.ShapeDtypeStruct((1, n_out), jnp.float32),
        grid_spec=pltpu.PrefetchScalarGridSpec(
            num_scalar_prefetch=1,
            grid=(num_tiles,),
            in_specs=[
                # feature tile marches over N; pipelined by Pallas
                pl.BlockSpec((tile_m, d), lambda i, idx: (i, 0),
                             **feat_spec_kwargs),
                # embeddings: constant block index -> resident in VMEM
                pl.BlockSpec((c, d), lambda i, idx: (0, 0)),
            ],
            # lane-dense (1, TM) output slabs -> unmasked full-lane stores
            out_specs=pl.BlockSpec((1, tile_m), lambda i, idx: (0, i)),
        ),
        compiler_params=pltpu.CompilerParams(
            dimension_semantics=("parallel",),
            vmem_limit_bytes=vmem_limit),
    )(concept_index, features, concept_embeddings)

    return out[0, :n].reshape(n, 1)


def _reference(features, concept_embeddings, concept_index):
    f = features.astype(jnp.float32)
    e = concept_embeddings.astype(jnp.float32)
    probs = jax.nn.sigmoid(f @ e.T)
    mask = (jnp.arange(probs.shape[1]) == concept_index[0])
    num = jnp.sum(jnp.where(mask, probs, 0.0), axis=-1, keepdims=True)
    rest = jnp.sum(jnp.where(mask, 0.0, probs), axis=-1, keepdims=True)
    return jnp.log(num) - jnp.log(rest)


if __name__ == "__main__":
    # TODO(synk): executor.type_constraints / get_type are Python-object graph
    # lookups; here the candidate set is the full embedding table.
    N, D, C = 200, 128, 8  # objects, feature dim, candidate concepts
    key = jax.random.PRNGKey(0)
    kf, ke = jax.random.split(key)
    features = jax.random.normal(kf, (N, D), dtype=jnp.float32) * 0.1
    concept_embeddings = jax.random.normal(ke, (C, D), dtype=jnp.float32) * 0.1
    concept_index = jnp.array([3], dtype=jnp.int32)  # deterministic target

    # Default path: bf16 matmul operands, f32 accumulation / epilogue.
    out_bf16 = predicate_filter(features, concept_embeddings, concept_index)
    out_bf16 = jax.block_until_ready(out_bf16)
    ref_bf16 = _reference(features.astype(jnp.bfloat16),
                          concept_embeddings.astype(jnp.bfloat16),
                          concept_index)
    assert out_bf16.shape == (N, 1)
    assert jnp.allclose(out_bf16, ref_bf16, atol=2e-3, rtol=2e-3)

    # Full-f32 path: tight check against the f32 reference.
    out_f32 = predicate_filter(features, concept_embeddings, concept_index,
                               use_bf16_matmul=False)
    out_f32 = jax.block_until_ready(out_f32)
    ref_f32 = _reference(features, concept_embeddings, concept_index)
    assert jnp.allclose(out_f32, ref_f32, atol=1e-5, rtol=1e-5)

    print("KERNEL_OK")
</pallas_src>

<mosaic_0001>
module attributes {stable_mosaic.version = 11 : i64} {
  func.func @_predicate_filter_kernel(%arg0: i32, %arg1: memref<1xi32, #tpu.memory_space<smem>>, %arg2: memref<128x128xbf16, #tpu.memory_space<vmem>>, %arg3: memref<8x128xbf16, #tpu.memory_space<vmem>>, %arg4: memref<1x128xf32, #tpu.memory_space<vmem>>) attributes {dimension_semantics = [#tpu.dimension_semantics<parallel>], iteration_bounds = array<i64: 2>, scalar_prefetch = 1 : i64, scratch_operands = 0 : i64, tpu.core_type = #tpu.core_type<tc>, window_params = [{transform_indices = @transform_0, window_bounds = array<i64: 128, 128>}, {pipeline_mode = #tpu.pipeline_mode<synchronous>, transform_indices = @transform_1, window_bounds = array<i64: 8, 128>}, {transform_indices = @transform_2, window_bounds = array<i64: 1, 128>}]} {
    %c0 = arith.constant 0 : index
    %c0_0 = arith.constant 0 : index
    %0 = vector.load %arg2[%c0, %c0_0] : memref<128x128xbf16, #tpu.memory_space<vmem>>, vector<128x128xbf16>
    %c0_1 = arith.constant 0 : index
    %c0_2 = arith.constant 0 : index
    %1 = vector.load %arg3[%c0_1, %c0_2] : memref<8x128xbf16, #tpu.memory_space<vmem>>, vector<8x128xbf16>
    %cst = arith.constant dense<0.000000e+00> : vector<8x128xf32>
    %2 = tpu.matmul %1, %0, %cst {dimension_numbers = #tpu.dot_dimension_numbers<[1], [1], [0], [0], [0, 0, 1, 0], [], []>} : vector<8x128xbf16>, vector<128x128xbf16>, vector<8x128xf32> -> vector<8x128xf32>
    %3 = arith.negf %2 : vector<8x128xf32>
    %4 = math.exp %3 : vector<8x128xf32>
    %cst_3 = arith.constant 1.000000e+00 : f32
    %5 = vector.broadcast %cst_3 : f32 to vector<8x128xf32>
    %6 = arith.addf %5, %4 : vector<8x128xf32>
    %7 = arith.divf %5, %6 : vector<8x128xf32>
    %c0_4 = arith.constant 0 : index
    %8 = memref.load %arg1[%c0_4] : memref<1xi32, #tpu.memory_space<smem>>
    %9 = tpu.iota {dimensions = array<i32: 0>} : vector<8x1xi32>
    %10 = vector.broadcast %8 : i32 to vector<8x1xi32>
    %11 = arith.cmpi eq, %9, %10 : vector<8x1xi32>
    %cst_5 = arith.constant 0.000000e+00 : f32
    %12 = vector.shape_cast %11 : vector<8x1xi1> to vector<8x1xi1>
    %13 = vector.broadcast %12 : vector<8x1xi1> to vector<8x128xi1>
    %14 = vector.broadcast %cst_5 : f32 to vector<8x128xf32>
    %15 = arith.select %13, %7, %14 : vector<8x128xi1>, vector<8x128xf32>
    %cst_6 = arith.constant dense<0.000000e+00> : vector<128xf32>
    %16 = vector.multi_reduction <add>, %15, %cst_6 [0] : vector<8x128xf32> to vector<128xf32>
    %17 = vector.shape_cast %16 : vector<128xf32> to vector<1x128xf32>
    %cst_7 = arith.constant 0.000000e+00 : f32
    %18 = vector.shape_cast %11 : vector<8x1xi1> to vector<8x1xi1>
    %19 = vector.broadcast %18 : vector<8x1xi1> to vector<8x128xi1>
    %20 = vector.broadcast %cst_7 : f32 to vector<8x128xf32>
    %21 = arith.select %19, %20, %7 : vector<8x128xi1>, vector<8x128xf32>
    %cst_8 = arith.constant dense<0.000000e+00> : vector<128xf32>
    %22 = vector.multi_reduction <add>, %21, %cst_8 [0] : vector<8x128xf32> to vector<128xf32>
    %23 = vector.shape_cast %22 : vector<128xf32> to vector<1x128xf32>
    %24 = math.log %17 : vector<1x128xf32>
    %25 = math.log %23 : vector<1x128xf32>
    %26 = arith.subf %24, %25 : vector<1x128xf32>
    %c0_9 = arith.constant 0 : index
    %c0_10 = arith.constant 0 : index
    %27 = vector.load %arg4[%c0_9, %c0_10] : memref<1x128xf32, #tpu.memory_space<vmem>>, vector<1x128xf32>
    tpu.vector_store %arg4[%c0_9, %c0_10], %26 {strides = array<i32>} : memref<1x128xf32, #tpu.memory_space<vmem>>, vector<1x128xf32>,
    return
  }
  func.func @transform_0(%arg0: i32, %arg1: memref<1xi32, #tpu.memory_space<smem>>) -> (i32, i32) {
    %c0_i32 = arith.constant 0 : i32
    %c0_i32_0 = arith.constant 0 : i32
    return %arg0, %c0_i32 : i32, i32
  }
  func.func @transform_1(%arg0: i32, %arg1: memref<1xi32, #tpu.memory_space<smem>>) -> (i32, i32) {
    %c0_i32 = arith.constant 0 : i32
    %c0_i32_0 = arith.constant 0 : i32
    %c0_i32_1 = arith.constant 0 : i32
    return %c0_i32, %c0_i32_0 : i32, i32
  }
  func.func @transform_2(%arg0: i32, %arg1: memref<1xi32, #tpu.memory_space<smem>>) -> (i32, i32) {
    %c0_i32 = arith.constant 0 : i32
    %c0_i32_0 = arith.constant 0 : i32
    return %c0_i32, %arg0 : i32, i32
  }
}

</mosaic_0001>

<bundles_post_ra>
// kernel: tpu_custom_call.1
= control target key start
LH: loop header
LB: loop body
LE: loop exit
PB: predicated region body
PF: predicated region fallthrough
CT: control target
= control target key end

     0   :  { %s791_s0 = inlined_call_operand.<no memory space> [shape: s32[1], index: 0, kind: input, shape index: {}]   ;;  %s792_s1 = inlined_call_operand.hbm [shape: bf16[200,128], index: 1, kind: input, shape index: {}]   ;;  %s793_s2 = inlined_call_operand.vmem [shape: bf16[8,128], index: 2, kind: input, shape index: {}]   ;;  %s794_s3 = inlined_call_operand.hbm [shape: f32[1,256], index: 3, kind: output, shape index: {}]  }
   0x1   :  { %8 = sst [smem:[#allocation3]] %s791_s0 }
   0x2   :  { %9 = vsyncpa [#allocation5], 0 }
   0x3   :  { %11 = vsyncpa [#allocation5 + $0x1], 0 }
   0x4   :  { %12 = vsyncpa [#allocation6], 0 }
   0x5   :  { %14 = vsyncpa [#allocation6 + $0x1], 0  ;;  %s631_s14 = smov 0   ;;  %s633_s15 = smov 0  }
   0x6   :  { %s635_s16 = smov 0   ;;  %s637_s17 = smov 0  }
   0x7 LB: > { %s652_s0 = sadd.s32 4294967295, %s600_s17   ;;  %s392_s18 = sadd.s32 4294967294, %s600_s17   ;;  %s600_s17 = sphi %s637_s17, %s804_s17   ;;  %s596_s16 = sphi %s635_s16, %s803_s16   ;;  %s592_s15 = sphi %s633_s15, %s802_s15   ;;  %s588_s14 = sphi %s631_s14, %s801_s14  }
   0x8   : > { %s656_s19 = sadd.s32 1, %s600_s17   ;;  %s27_s20 = sadd.s32 1, %s596_s16 }
   0x9   : > { %s24_s21 = ssub.s32 %s600_s17, %s656_s19  ;;  %p34_p0 = scmp.ne.s32.totalorder %s596_s16, %s592_s15 }
   0xa   : > { %p25_p1 = scmp.eq.s32.totalorder %s24_s21, 0  ;;  %p35_p2 = scmp.eq.s32.totalorder %s600_s17, 0 }
   0xb   : > { %p40_p3 = scmp.ne.s32.totalorder %s592_s15, %s588_s14  ;;  %p41_p4 = scmp.eq.s32.totalorder %s652_s0, 0 }
   0xc   : > { %s668_s22 = scalar_select %p25_p1, %s596_s16, %s27_s20  }
   0xd   : > { %p36_p5 = por %p35_p2, %p34_p0  ;;  %p670_p6 = por %p41_p4, %p40_p3 }
   0xe   : > { %p85_p7 = scmp.eq.s32.totalorder %s652_s0, 1  ;;  %p91_p8 = scmp.eq.s32.totalorder %s392_s18, 1 }
   0xf   : > { %p795_p11 = scmp.ge.s32.totalorder %s600_s17, 2 }
  0x10   : > { %p675_p9 = por %p85_p7, %p34_p0  ;;  %p679_p10 = por %p91_p8, %p40_p3 }
  0x11   : > { %110 = sbr.rel (%p795_p11) target bundleno = 59 (0x3b), region = 20 }
  0x12   : > { %s798_s25 = scalar_select %p679_p10, 1, 0 }
  0x18   : > { %113 = sbr.rel (!%p36_p5) target bundleno = 59 (0x3b), region = 24  ;;  %s114_s26 = sand.u32 (%p36_p5), 1, %s596_s16  }
  0x19   : > { %s396_s27 = sshll.u32 (%p36_p5), %s600_s17, 4  ;;  %s395_s28 = sshll.u32 (%p36_p5), %s114_s26, 6 }
  0x1a   : > { %s120_s29 = ssub.s32 (%p36_p5), 25, %s396_s27  ;;  %s691_s5 = scalar_lea.sflag (%p36_p5), [#allocation5], %s114_s26 }
  0x1b   : > { %p121_p12 = scmp.lt.s32.totalorder (%p36_p5), %s120_s29, 16  ;;  %s118_s6 = scalar_lea.vmem (%p36_p5), [#allocation4], %s395_s28 }
  0x1f   : > { %s806_s29 = smov (!%p121_p12, %s120_s29), 16 }
  0x20   : > { %s688_s30 = sshll.u32 %s806_s29, 6 }
  0x21   : > { %s125_s4 = ssub.s32 1024, %s688_s30 }
  0x22   : > { %126 = vsyncadd %s691_s5, %s125_s4  ;;  %p398_p13 = scmp.ne.s32.totalorder %s688_s30, 0  ;;  %s416_s7 = sshll.u32 %s600_s17, 10 }
  0x23   : > { %s699_s10 = scalar_lea.hbm %s792_s1, %s416_s7  ;;  %s131_s11 = sshll.u32 %s118_s6, 4  ;;  %s701_s11 = int_to_ptr.vmem [resolvable:$true] %s131_s11 }
  0x24   : > { %s506_s12 = scalar_lea.hbm %s699_s10, %s688_s30  ;;  %s510_s20 = scalar_lea.hbm %s792_s1, 1600 }
  0x25   : > { %p507_p0 = scmp.ne.s32.totalorder %s699_s10, %s506_s12  ;;  %p511_p3 = scmp.lt.u32.totalorder %s699_s10, %s792_s1 }
  0x26   : > { %p512_p4 = scmp.lt.u32.totalorder %s510_s20, %s506_s12  ;;  %p514_p7 = scmp.lt.u32.totalorder %s506_s12, %s699_s10 }
  0x27   : > { %p508_p1 = pnand %p507_p0, %p398_p13 }
  0x28   : > { %p513_p5 = por %p512_p4, %p511_p3 }
  0x29   : > { %p509_p2 = pneg %p508_p1 }
  0x2a   : > { %p515_p8 = por %p514_p7, %p513_p5 }
  0x2c   : > { %p516_p12 = pnand %p515_p8, %p509_p2 }
  0x2e   : > { %519 = shalt.err (!%p516_p12)
}
  0x2f   : > { %s520_s27 = scalar_lea.vmem %s701_s11, %s688_s30  ;;  %s602_s28 = smov [#allocation4]  }
  0x30   : > { %p521_p0 = scmp.ne.s32.totalorder %s701_s11, %s520_s27  ;;  %s524_s29 = sshll.u32 %s602_s28, 4  ;;  %s525_s29 = int_to_ptr.vmem [resolvable:$false] %s524_s29 }
  0x31   : > { %s526_s4 = scalar_lea.vmem %s525_s29, 2048  ;;  %p527_p10 = scmp.lt.s32.totalorder %s701_s11, %s525_s29 }
  0x32   : > { %p522_p1 = pnand %p521_p0, %p398_p13  ;;  %p528_p3 = scmp.lt.s32.totalorder %s526_s4, %s520_s27 }
  0x34   : > { %p523_p11 = pneg %p522_p1  ;;  %p529_p4 = por %p528_p3, %p527_p10 }
  0x36   : > { %p530_p5 = pnand %p529_p4, %p523_p11 }
  0x38   : > { %533 = shalt.err (!%p530_p5)
}
  0x39   : > { %s603_s6 = smov 64   ;;  %s604_s7 = smov 4  }
  0x3a   : > { %137 = dma.hbm_to_vmem [thread:$0]  (%p398_p13), %s699_s10, %s688_s30, %s701_s11, %s691_s5, %s603_s6, %s603_s6, %s604_s7  }
  0x3b PF: > { %p402_p2 = scmp.ge.s32.totalorder %s600_s17, 1  ;;  %p139_p7 = scmp.lt.s32.totalorder %s600_s17, 3 }
  0x3d   : > { %p140_p8 = pnand %p402_p2, %p139_p7 }
  0x3e   : > { %s731_s8 = sand.u32 (!%p140_p8), 1, %s592_s15  }
  0x3f   : > { %143 = sbr.rel (%p140_p8) target bundleno = 417 (0x1a1), region = 28  ;;  %s403_s9 = sshll.u32 (!%p140_p8), %s731_s8, 6 }
  0x40   : > { %s146_s12 = scalar_lea.sflag (!%p140_p8), [#allocation5], %s731_s8  ;;  %s149_s13 = scalar_lea.vmem (!%p140_p8), [#allocation4], %s403_s9 }
  0x46   : > { %579 = dma.done.wait (%p670_p6), %s146_s12, 1024  }
  0x47   : > { %581 = vsyncadd (%p670_p6), %s146_s12, 4294966272  ;;  %v605_v0 = vmov 0.0   ;;  %vm606_vm0 = vmmov 0   ;;  %v490_v1 = vld [vmem:[%s149_s13] sm:$0xff]   ;;  %v491_v2 = vld [vmem:[%s149_s13 + $0x8] sm:$0xff]   ;;  %s286_s5 = sld [smem:[#allocation3]]  ;;  %v287_v17 = vlaneseq }
  0x48   : > { %426 = vmatprep.subr.bf16.mxu0 %v605_v0  ;;  %442 = vmatprep.mubr.msk.bf16.mxu0 %vm606_vm0, %v605_v0  ;;  %v492_v3 = vld [vmem:[%s149_s13 + $0x10] sm:$0xff]   ;;  %v493_v4 = vld [vmem:[%s149_s13 + $0x18] sm:$0xff]   ;;  %v494_v5 = vld [vmem:[%s149_s13 + $0x20] sm:$0xff]   ;;  %s413_s10 = sshll.u32 %s652_s0, 4  ;;  %s168_s11 = scalar_lea.vmem [#allocation7], %s731_s8 }
  0x49   : > { %427 = vmatpush3.bf16.xpose.msra.mxu0 %v490_v1  ;;  %v495_v6 = vld [vmem:[%s149_s13 + $0x28] sm:$0xff]   ;;  %v496_v7 = vld [vmem:[%s149_s13 + $0x30] sm:$0xff]   ;;  %v497_v8 = vld [vmem:[%s149_s13 + $0x38] sm:$0xff]   ;;  %v288_v18 = vshrl.u32 %v287_v17, 7  ;;  %s326_s18 = sshll.u32 %s168_s11, 4  ;;  %s747_s26 = scalar_lea.hbm %s794_s3, %s413_s10  ;;  %s749_s18 = int_to_ptr.vmem [resolvable:$true] %s326_s18 }
  0x4a   : > { %428 = vmatprep.subr.bf16.mxu0 %v605_v0  ;;  %v191_v9 = vld [vmem:[%s793_s2] sm:$0xf]  ;;  %s314_s27 = scalar_lea.sflag [#allocation6], %s731_s8  ;;  %s534_s28 = scalar_lea.vmem %s749_s18, 16 }
  0x4b   : > { %p535_p6 = scmp.ne.s32.totalorder %s749_s18, %s534_s28  ;;  %s607_s0 = smov [#allocation7]  }
  0x4c   : > { %s538_s29 = sshll.u32 %s607_s0, 4  ;;  %s539_s29 = int_to_ptr.vmem [resolvable:$false] %s538_s29 }
  0x4d   : > { %v289_v19 = vstv %s286_s5  ;;  %p536_p10 = pnand %p535_p6, %p675_p9  ;;  %s540_s4 = scalar_lea.vmem %s539_s29, 32 }
  0x4e   : > { %vm290_vm1 = vcmp.eq.s32.totalorder %v288_v18, %v289_v19  ;;  %p541_p13 = scmp.lt.s32.totalorder %s749_s18, %s539_s29  ;;  %p542_p12 = scmp.lt.s32.totalorder %s540_s4, %s534_s28 }
  0x4f   : > { %p537_p11 = pneg %p536_p10 }
  0x50   : > { %p543_p0 = por %p542_p12, %p541_p13 }
  0x51   : > { %429 = vmatpush3.bf16.xpose.msra.mxu0 %v491_v2 }
  0x52   : > { %430 = vmatprep.subr.bf16.mxu0 %v605_v0  ;;  %p544_p1 = pnand %p543_p0, %p537_p11 }
  0x59   : > { %431 = vmatpush3.bf16.xpose.msra.mxu0 %v492_v3 }
  0x5a   : > { %432 = vmatprep.subr.bf16.mxu0 %v605_v0 }
  0x61   : > { %433 = vmatpush3.bf16.xpose.msra.mxu0 %v493_v4 }
  0x62   : > { %434 = vmatprep.subr.bf16.mxu0 %v605_v0 }
  0x69   : > { %435 = vmatpush3.bf16.xpose.msra.mxu0 %v494_v5 }
  0x6a   : > { %436 = vmatprep.subr.bf16.mxu0 %v605_v0 }
  0x71   : > { %437 = vmatpush3.bf16.xpose.msra.mxu0 %v495_v6 }
  0x72   : > { %438 = vmatprep.subr.bf16.mxu0 %v605_v0 }
  0x79   : > { %439 = vmatpush3.bf16.xpose.msra.mxu0 %v496_v7 }
  0x7a   : > { %440 = vmatprep.subr.bf16.mxu0 %v605_v0 }
  0x81   : > { %441 = vmatpush3.bf16.xpose.msra.mxu0 %v497_v8 }
  0x88   : > { %443 = vmatmul.mubr.bf16.vlgmr.msra.gmra.mrb[0].mxu0 %v191_v9 }
 0x15b   : > { %v274_v10 = vpop.f32.mrb[0].mxu0 }
 0x15c   : > { %v412_v11 = vmul.f32 -1.442695, %v274_v10  ;;  %v444_v12 = vpop.f32.mrb[1].mxu0 }
 0x15d   : > { %v277_v13 = vpop.f32.mrb[2].mxu0 }
 0x15e   : > { %498 = vpow2.f32 %v412_v11  ;;  %v445_v14 = vpop.f32.mrb[3].mxu0 }
 0x168   : > { %v499_v15 = vpop.eup %498 }
 0x169   : > { %v283_v16 = vadd.f32 1.0, %v499_v15 }
 0x16b   : > { %500 = vrcp.f32 %v283_v16 }
 0x175   : > { %v501_v20 = vpop.eup %500 }
 0x176   : > { %v293_v21 = vsel %vm290_vm1, %v501_v20, 0.0  ;;  %v300_v22 = vsel %vm290_vm1, 0.0, %v501_v20 }
 0x177   : > { %v294_v23 = vrot.slane %v293_v21, 4  ;;  %v301_v24 = vrot.slane %v300_v22, 4 }
 0x179   : > { %v295_v25 = vadd.f32 %v294_v23, %v293_v21  ;;  %v302_v26 = vadd.f32 %v301_v24, %v300_v22 }
 0x17b   : > { %v296_v27 = vrot.slane %v295_v25, 2  ;;  %v303_v28 = vrot.slane %v302_v26, 2 }
 0x17d   : > { %v297_v29 = vadd.f32 %v296_v27, %v295_v25  ;;  %v304_v30 = vadd.f32 %v303_v28, %v302_v26 }
 0x17f   : > { %v298_v31 = vrot.slane %v297_v29, 1  ;;  %v305_v32 = vrot.slane %v304_v30, 1 }
 0x181   : > { %v299_v33 = vadd.f32 %v298_v31, %v297_v29  ;;  %v306_v34 = vadd.f32 %v305_v32, %v304_v30 }
 0x183   : > { %502 = vlog2.f32 %v299_v33 }
 0x184   : > { %504 = vlog2.f32 %v306_v34 }
 0x18d   : > { %v503_v35 = vpop.eup %502 }
 0x18e   : > { %v505_v36 = vpop.eup %504  ;;  %v308_v37 = vmul.f32 0.6931472, %v503_v35 }
 0x18f   : > { %v310_v38 = vmul.f32 0.6931472, %v505_v36 }
 0x191   : > { %v311_v39 = vsub.f32 %v308_v37, %v310_v38 }
 0x193   : > { %312 = vst [vmem:[%s168_s11] sm:$0x1] %v311_v39 }
 0x194   : > { %547 = shalt.err (!%p544_p1)
}
 0x195   : > { %s548_s6 = scalar_lea.hbm %s747_s26, 16  ;;  %s552_s9 = scalar_lea.hbm %s794_s3, 32 }
 0x196   : > { %p549_p3 = scmp.ne.s32.totalorder %s747_s26, %s548_s6  ;;  %p553_p2 = scmp.lt.u32.totalorder %s747_s26, %s794_s3 }
 0x197   : > { %p554_p7 = scmp.lt.u32.totalorder %s552_s9, %s548_s6  ;;  %p556_p6 = scmp.lt.u32.totalorder %s548_s6, %s747_s26 }
 0x198   : > { %p550_p4 = pnand %p549_p3, %p675_p9 }
 0x199   : > { %p555_p8 = por %p554_p7, %p553_p2 }
 0x19a   : > { %p551_p5 = pneg %p550_p4 }
 0x19b   : > { %p557_p10 = por %p556_p6, %p555_p8 }
 0x19d   : > { %p558_p11 = pnand %p557_p10, %p551_p5 }
 0x19f   : > { %561 = shalt.err (!%p558_p11)
}
 0x1a0   : > { %447 = dma.vmem_to_hbm [thread:$0]  (%p675_p9), %s749_s18, 16, %s747_s26, %s314_s27  }
 0x1a1 PF: > { %s338_s23 = sand.u32 1, %s588_s14   ;;  %p799_p13 = scmp.ne.s32.totalorder %s798_s25, 0 }
 0x1a2   : > { %p800_p12 = scmp.ge.s32.totalorder %s600_s17, 2  ;;  %s339_s30 = scalar_lea.sflag [#allocation6], %s338_s23 }
 0x1a4   : > { %p450_p0 = pnand %p800_p12, %p799_p13 }
 0x1a6   : > { %583 = dma.done.wait (!%p450_p0), %s339_s30, 16  }
 0x1a7   : > { %585 = vsyncadd (!%p450_p0), %s339_s30, 4294967280  ;;  %p17_p1 = scmp.ge.s32.totalorder %s656_s19, 4   ;;  %s801_s14 = smov %s592_s15 }
 0x1a8   : > { %s802_s15 = smov %s596_s16  ;;  %s803_s16 = smov %s668_s22 }
 0x1a9   : > { %s804_s17 = smov %s656_s19  ;;  %19 = sbr.rel (!%p17_p1) target bundleno = 7 (0x7), region = 73 }
 0x1b0   :  { %343 = vsyncpa [#allocation5], 1 }
 0x1b1   :  { %345 = vsyncpa [#allocation5 + $0x1], 1 }
 0x1b2   :  { %346 = vsyncpa [#allocation6], 1 }
 0x1b3   :  { %348 = vsyncpa [#allocation6 + $0x1], 1 }

</bundles_post_ra>
